<compile_context>
chip_gen: v6e
topology: v6e:2x2x1
jax: 0.10.0
libtpu: 0.0.40
codegen_flags: <defaults>
</compile_context>

<pallas_src>
import jax
import jax.numpy as jnp
from jax.experimental import pallas as pl
from jax.experimental.pallas import tpu as pltpu

N_NODES = 10
N_EDGES = 10
NUM_SPECIES = 5
HIDDEN = 32
NUM_RADIAL = 8
SH_DIM = 4          # simplified real spherical harmonics: l=0 (1) + l=1 (3)
RBF_CUTOFF = 5.0


def _round_up(x, m):
    return ((x + m - 1) // m) * m


N_PAD = _round_up(N_NODES, 8)   # 16 rows: full-vreg sublane groups, no tail masking
E_PAD = _round_up(N_EDGES, 8)   # 16 rows


# ---------------------------------------------------------------------------
# Single fused kernel: layers[0..5] of the forward pass.
# ---------------------------------------------------------------------------
def fused_kernel(src_col_ref, dst_col_ref, dst_row_ref, z_col_ref,
                 pos_ref, shift_ref, mu_ref,
                 w_embed_ref, w_rs_ref, w_head_ref, out_ref):
    f32 = jnp.float32
    src_col = src_col_ref[...]          # (E_PAD, 1) int32
    dst_col = dst_col_ref[...]          # (E_PAD, 1) int32
    dst_row = dst_row_ref[...]          # (1, E_PAD) int32
    z_col = z_col_ref[...]              # (N_PAD, 1) int32
    pos = pos_ref[...]                  # (N_PAD, 3)
    shift = shift_ref[...]              # (E_PAD, 3)

    # --- layers[2] + layers[3]: one-hot species embedding + linear node embedding ---
    sp_iota = jax.lax.broadcasted_iota(jnp.int32, (N_PAD, NUM_SPECIES), 1)
    node_attr = (sp_iota == z_col).astype(f32)                            # (N_PAD, S)
    node_feat = jnp.dot(node_attr, w_embed_ref[...],
                        preferred_element_type=f32)                       # (N_PAD, H)

    # --- in-kernel gather masks (replace XLA gathers of pos/node_feat) ---
    node_iota_e = jax.lax.broadcasted_iota(jnp.int32, (E_PAD, N_PAD), 1)
    g_src = (node_iota_e == src_col).astype(f32)                          # (E_PAD, N_PAD)
    g_dst = (node_iota_e == dst_col).astype(f32)                          # (E_PAD, N_PAD)

    # --- layers[0]: edge geometry + simplified spherical harmonics ---
    edge_vec = jnp.dot(g_dst - g_src, pos, preferred_element_type=f32) + shift
    r2 = jnp.sum(edge_vec * edge_vec, axis=-1, keepdims=True)             # (E_PAD, 1)
    inv_r = jax.lax.rsqrt(jnp.maximum(r2, f32(1e-24)))                    # EUP slot
    r = r2 * inv_r                                                        # edge length
    unit = edge_vec * inv_r
    edge_sh = jnp.concatenate([jnp.ones_like(r), unit], axis=-1)          # (E_PAD, 4)

    # --- layers[1]: Gaussian radial basis expansion of the edge length ---
    gamma = f32(NUM_RADIAL / RBF_CUTOFF)
    diff = r - mu_ref[...]                                                # (E_PAD, R)
    edge_feat = jnp.exp(-gamma * diff * diff)

    # --- layers[4]: message-passing convolution ---
    # one MXU call for radial + angular mixing (block-diagonal weight)
    mixed = jnp.dot(jnp.concatenate([edge_feat, edge_sh], axis=-1),
                    w_rs_ref[...], preferred_element_type=f32)            # (E_PAD, 2H)
    w_e = mixed[:, :HIDDEN]
    sh_w = mixed[:, HIDDEN:]
    nf_src = jnp.dot(g_src, node_feat, preferred_element_type=f32)        # (E_PAD, H)
    valid = (jax.lax.broadcasted_iota(jnp.int32, (E_PAD, 1), 0)
             < N_EDGES).astype(f32)                                       # mask padded edges
    msg = nf_src * w_e * sh_w * valid                                     # (E_PAD, H)

    # scatter-add to destination nodes as a one-hot matmul on the MXU
    # TODO(synk): replace dense iota-mask gather/scatter with CSR scalar-prefetch
    #             accumulation when scaling to large graphs (O(N*E) VMEM otherwise).
    node_iota_n = jax.lax.broadcasted_iota(jnp.int32, (N_PAD, E_PAD), 0)
    scatter = (node_iota_n == dst_row).astype(f32)                        # (N_PAD, E_PAD)
    agg = jnp.dot(scatter, msg, preferred_element_type=f32)               # (N_PAD, H)

    # --- layers[5] folded into the conv output head: forces directly ---
    out_ref[...] = jnp.dot(jnp.concatenate([agg, node_attr], axis=-1),
                           w_head_ref[...], preferred_element_type=f32)   # (N_PAD, 3)


def fused_forward(src_col, dst_col, dst_row, z_col, pos_p, shift_p, mu,
                  w_embed, w_rs, w_head):
    def full(shape):
        return pl.BlockSpec(shape, lambda i: (0, 0))

    in_arrays = (src_col, dst_col, dst_row, z_col, pos_p, shift_p, mu,
                 w_embed, w_rs, w_head)
    return pl.pallas_call(
        fused_kernel,
        grid=(1,),
        in_specs=[full(a.shape) for a in in_arrays],
        out_specs=full((N_PAD, 3)),
        out_shape=jax.ShapeDtypeStruct((N_PAD, 3), jnp.float32),
        compiler_params=pltpu.CompilerParams(
            dimension_semantics=("arbitrary",)),
    )(*in_arrays)


# ---------------------------------------------------------------------------
# Full forward pass (mirrors Model.forward)
# ---------------------------------------------------------------------------
def model_forward(params, z, pos, edge_index, shift_vector):
    src = edge_index[0].astype(jnp.int32)
    dst = edge_index[1].astype(jnp.int32)
    E = src.shape[0]
    N = pos.shape[0]

    # pad rows to the sublane multiple once (tiny int/float plumbing, outside the kernel)
    src_col = jnp.pad(src, (0, E_PAD - E)).reshape(E_PAD, 1)
    dst_p = jnp.pad(dst, (0, E_PAD - E))
    dst_col = dst_p.reshape(E_PAD, 1)
    dst_row = dst_p.reshape(1, E_PAD)
    z_col = jnp.pad(z.astype(jnp.int32), (0, N_PAD - N)).reshape(N_PAD, 1)
    pos_p = jnp.pad(pos, ((0, N_PAD - N), (0, 0)))
    shift_p = jnp.pad(shift_vector, ((0, E_PAD - E), (0, 0)))

    # algebraic fold of layers[5] into the conv output head (no intervening nonlinearity)
    w_head = jnp.concatenate([params["w_out"] @ params["w_force"],
                              params["w_self"] @ params["w_force"]], axis=0)  # (H+S, 3)
    # block-diagonal stack of radial / angular mixing weights -> single MXU call
    zeros_rh = jnp.zeros((NUM_RADIAL, HIDDEN), jnp.float32)
    zeros_sh = jnp.zeros((SH_DIM, HIDDEN), jnp.float32)
    w_rs = jnp.concatenate(
        [jnp.concatenate([params["w_radial"], zeros_rh], axis=1),
         jnp.concatenate([zeros_sh, params["w_sh"]], axis=1)], axis=0)        # (R+4, 2H)

    out = fused_forward(src_col, dst_col, dst_row, z_col, pos_p, shift_p,
                        params["rbf_mu"], params["w_embed"], w_rs, w_head)
    return out[:N]                                                            # (N, 3) forces


def init_params(key):
    ks = jax.random.split(key, 6)
    scale = 0.1
    return {
        "rbf_mu": jnp.linspace(0.0, RBF_CUTOFF, NUM_RADIAL,
                               dtype=jnp.float32).reshape(1, NUM_RADIAL),
        "w_embed": scale * jax.random.normal(ks[0], (NUM_SPECIES, HIDDEN), jnp.float32),
        "w_radial": scale * jax.random.normal(ks[1], (NUM_RADIAL, HIDDEN), jnp.float32),
        "w_sh": scale * jax.random.normal(ks[2], (SH_DIM, HIDDEN), jnp.float32),
        "w_out": scale * jax.random.normal(ks[3], (HIDDEN, HIDDEN), jnp.float32),
        "w_self": scale * jax.random.normal(ks[4], (NUM_SPECIES, HIDDEN), jnp.float32),
        "w_force": scale * jax.random.normal(ks[5], (HIDDEN, 3), jnp.float32),
    }


if __name__ == "__main__":
    key = jax.random.PRNGKey(0)
    k_pos, k_shift, k_z, k_param = jax.random.split(key, 4)

    edge_index = jnp.array(
        [[0, 1, 2, 3, 4, 5, 6, 7, 8, 9],
         [1, 2, 3, 4, 5, 6, 7, 8, 9, 0]], dtype=jnp.int32)
    pos = jax.random.normal(k_pos, (N_NODES, 3), jnp.float32)
    shift_vector = jax.random.normal(k_shift, (N_EDGES, 3), jnp.float32)
    z = jax.random.randint(k_z, (N_NODES,), 0, NUM_SPECIES, jnp.int32)

    params = init_params(k_param)

    forces = jax.jit(model_forward)(params, z, pos, edge_index, shift_vector)
    forces = jax.block_until_ready(forces)
    assert forces.shape == (N_NODES, 3) and forces.dtype == jnp.float32
    assert bool(jnp.all(jnp.isfinite(forces)))
    print("KERNEL_OK")
</pallas_src>

<mosaic_0001>
module attributes {stable_mosaic.version = 11 : i64} {
  func.func @fused_kernel(%arg0: i32, %arg1: memref<16x1xi32, #tpu.memory_space<vmem>>, %arg2: memref<16x1xi32, #tpu.memory_space<vmem>>, %arg3: memref<1x16xi32, #tpu.memory_space<vmem>>, %arg4: memref<16x1xi32, #tpu.memory_space<vmem>>, %arg5: memref<16x3xf32, #tpu.memory_space<vmem>>, %arg6: memref<16x3xf32, #tpu.memory_space<vmem>>, %arg7: memref<1x8xf32, #tpu.memory_space<vmem>>, %arg8: memref<5x32xf32, #tpu.memory_space<vmem>>, %arg9: memref<12x64xf32, #tpu.memory_space<vmem>>, %arg10: memref<37x3xf32, #tpu.memory_space<vmem>>, %arg11: memref<16x3xf32, #tpu.memory_space<vmem>>) attributes {dimension_semantics = [#tpu.dimension_semantics<arbitrary>], iteration_bounds = array<i64: 1>, scalar_prefetch = 0 : i64, scratch_operands = 0 : i64, tpu.core_type = #tpu.core_type<tc>, window_params = [{pipeline_mode = #tpu.pipeline_mode<synchronous>, transform_indices = @transform_0, window_bounds = array<i64: 16, 1>}, {pipeline_mode = #tpu.pipeline_mode<synchronous>, transform_indices = @transform_1, window_bounds = array<i64: 16, 1>}, {pipeline_mode = #tpu.pipeline_mode<synchronous>, transform_indices = @transform_2, window_bounds = array<i64: 1, 16>}, {pipeline_mode = #tpu.pipeline_mode<synchronous>, transform_indices = @transform_3, window_bounds = array<i64: 16, 1>}, {pipeline_mode = #tpu.pipeline_mode<synchronous>, transform_indices = @transform_4, window_bounds = array<i64: 16, 3>}, {pipeline_mode = #tpu.pipeline_mode<synchronous>, transform_indices = @transform_5, window_bounds = array<i64: 16, 3>}, {pipeline_mode = #tpu.pipeline_mode<synchronous>, transform_indices = @transform_6, window_bounds = array<i64: 1, 8>}, {pipeline_mode = #tpu.pipeline_mode<synchronous>, transform_indices = @transform_7, window_bounds = array<i64: 5, 32>}, {pipeline_mode = #tpu.pipeline_mode<synchronous>, transform_indices = @transform_8, window_bounds = array<i64: 12, 64>}, {pipeline_mode = #tpu.pipeline_mode<synchronous>, transform_indices = @transform_9, window_bounds = array<i64: 37, 3>}, {pipeline_mode = #tpu.pipeline_mode<synchronous>, transform_indices = @transform_10, window_bounds = array<i64: 16, 3>}]} {
    %c0 = arith.constant 0 : index
    %c0_0 = arith.constant 0 : index
    %0 = vector.load %arg1[%c0, %c0_0] : memref<16x1xi32, #tpu.memory_space<vmem>>, vector<16x1xi32>
    %c0_1 = arith.constant 0 : index
    %c0_2 = arith.constant 0 : index
    %1 = vector.load %arg2[%c0_1, %c0_2] : memref<16x1xi32, #tpu.memory_space<vmem>>, vector<16x1xi32>
    %c0_3 = arith.constant 0 : index
    %c0_4 = arith.constant 0 : index
    %2 = vector.load %arg3[%c0_3, %c0_4] : memref<1x16xi32, #tpu.memory_space<vmem>>, vector<1x16xi32>
    %c0_5 = arith.constant 0 : index
    %c0_6 = arith.constant 0 : index
    %3 = vector.load %arg4[%c0_5, %c0_6] : memref<16x1xi32, #tpu.memory_space<vmem>>, vector<16x1xi32>
    %c0_7 = arith.constant 0 : index
    %c0_8 = arith.constant 0 : index
    %4 = vector.load %arg5[%c0_7, %c0_8] : memref<16x3xf32, #tpu.memory_space<vmem>>, vector<16x3xf32>
    %c0_9 = arith.constant 0 : index
    %c0_10 = arith.constant 0 : index
    %5 = vector.load %arg6[%c0_9, %c0_10] : memref<16x3xf32, #tpu.memory_space<vmem>>, vector<16x3xf32>
    %6 = tpu.iota {dimensions = array<i32: 1>} : vector<16x5xi32>
    %7 = vector.broadcast %3 : vector<16x1xi32> to vector<16x5xi32>
    %8 = arith.cmpi eq, %6, %7 : vector<16x5xi32>
    %9 = arith.extui %8 : vector<16x5xi1> to vector<16x5xi32>
    %10 = arith.sitofp %9 : vector<16x5xi32> to vector<16x5xf32>
    %c0_11 = arith.constant 0 : index
    %c0_12 = arith.constant 0 : index
    %11 = vector.load %arg8[%c0_11, %c0_12] : memref<5x32xf32, #tpu.memory_space<vmem>>, vector<5x32xf32>
    %cst = arith.constant dense<0.000000e+00> : vector<16x32xf32>
    %12 = tpu.matmul %10, %11, %cst {dimension_numbers = #tpu.dot_dimension_numbers<[1], [0], [0], [1], [0, 0, 1, 1], [], []>} : vector<16x5xf32>, vector<5x32xf32>, vector<16x32xf32> -> vector<16x32xf32>
    %13 = tpu.iota {dimensions = array<i32: 1>} : vector<16x16xi32>
    %14 = vector.broadcast %0 : vector<16x1xi32> to vector<16x16xi32>
    %15 = arith.cmpi eq, %13, %14 : vector<16x16xi32>
    %16 = arith.extui %15 : vector<16x16xi1> to vector<16x16xi32>
    %17 = arith.sitofp %16 : vector<16x16xi32> to vector<16x16xf32>
    %18 = vector.broadcast %1 : vector<16x1xi32> to vector<16x16xi32>
    %19 = arith.cmpi eq, %13, %18 : vector<16x16xi32>
    %20 = arith.extui %19 : vector<16x16xi1> to vector<16x16xi32>
    %21 = arith.sitofp %20 : vector<16x16xi32> to vector<16x16xf32>
    %22 = arith.subf %21, %17 : vector<16x16xf32>
    %cst_13 = arith.constant dense<0.000000e+00> : vector<16x3xf32>
    %23 = tpu.matmul %22, %4, %cst_13 {dimension_numbers = #tpu.dot_dimension_numbers<[1], [0], [0], [1], [0, 0, 1, 1], [], []>} : vector<16x16xf32>, vector<16x3xf32>, vector<16x3xf32> -> vector<16x3xf32>
    %24 = arith.addf %23, %5 : vector<16x3xf32>
    %25 = arith.mulf %24, %24 : vector<16x3xf32>
    %cst_14 = arith.constant dense<0.000000e+00> : vector<16xf32>
    %26 = vector.multi_reduction <add>, %25, %cst_14 [1] : vector<16x3xf32> to vector<16xf32>
    %27 = vector.shape_cast %26 : vector<16xf32> to vector<16x1xf32>
    %cst_15 = arith.constant 1.000000e-24 : f32
    %28 = vector.broadcast %cst_15 : f32 to vector<16x1xf32>
    %29 = arith.maximumf %27, %28 : vector<16x1xf32>
    %30 = math.rsqrt %29 : vector<16x1xf32>
    %31 = arith.mulf %27, %30 : vector<16x1xf32>
    %32 = vector.broadcast %30 : vector<16x1xf32> to vector<16x3xf32>
    %33 = arith.mulf %24, %32 : vector<16x3xf32>
    %cst_16 = arith.constant 1.000000e+00 : f32
    %34 = vector.broadcast %cst_16 : f32 to vector<16x1xf32>
    %35 = tpu.concatenate %34, %33 in 1 : vector<16x1xf32>, vector<16x3xf32> -> vector<16x4xf32>
    %c0_17 = arith.constant 0 : index
    %c0_18 = arith.constant 0 : index
    %36 = vector.load %arg7[%c0_17, %c0_18] : memref<1x8xf32, #tpu.memory_space<vmem>>, vector<1x8xf32>
    %37 = vector.broadcast %31 : vector<16x1xf32> to vector<16x8xf32>
    %38 = vector.broadcast %36 : vector<1x8xf32> to vector<16x8xf32>
    %39 = arith.subf %37, %38 : vector<16x8xf32>
    %cst_19 = arith.constant 0.000000e+00 : f32
    %cst_20 = arith.constant 1.600000e+00 : f32
    %40 = arith.subf %cst_19, %cst_20 : f32
    %41 = vector.broadcast %40 : f32 to vector<16x8xf32>
    %42 = arith.mulf %41, %39 : vector<16x8xf32>
    %43 = arith.mulf %42, %39 : vector<16x8xf32>
    %44 = math.exp %43 : vector<16x8xf32>
    %45 = tpu.concatenate %44, %35 in 1 : vector<16x8xf32>, vector<16x4xf32> -> vector<16x12xf32>
    %c0_21 = arith.constant 0 : index
    %c0_22 = arith.constant 0 : index
    %46 = vector.load %arg9[%c0_21, %c0_22] : memref<12x64xf32, #tpu.memory_space<vmem>>, vector<12x64xf32>
    %cst_23 = arith.constant dense<0.000000e+00> : vector<16x64xf32>
    %47 = tpu.matmul %45, %46, %cst_23 {dimension_numbers = #tpu.dot_dimension_numbers<[1], [0], [0], [1], [0, 0, 1, 1], [], []>} : vector<16x12xf32>, vector<12x64xf32>, vector<16x64xf32> -> vector<16x64xf32>
    %48 = vector.extract_strided_slice %47 {offsets = [0, 0], sizes = [16, 32], strides = [1, 1]} : vector<16x64xf32> to vector<16x32xf32>
    %49 = vector.extract_strided_slice %47 {offsets = [0, 32], sizes = [16, 32], strides = [1, 1]} : vector<16x64xf32> to vector<16x32xf32>
    %cst_24 = arith.constant dense<0.000000e+00> : vector<16x32xf32>
    %50 = tpu.matmul %17, %12, %cst_24 {dimension_numbers = #tpu.dot_dimension_numbers<[1], [0], [0], [1], [0, 0, 1, 1], [], []>} : vector<16x16xf32>, vector<16x32xf32>, vector<16x32xf32> -> vector<16x32xf32>
    %51 = tpu.iota {dimensions = array<i32: 0>} : vector<16x1xi32>
    %c10_i32 = arith.constant 10 : i32
    %52 = vector.broadcast %c10_i32 : i32 to vector<16x1xi32>
    %53 = arith.cmpi slt, %51, %52 : vector<16x1xi32>
    %54 = arith.extui %53 : vector<16x1xi1> to vector<16x1xi32>
    %55 = arith.sitofp %54 : vector<16x1xi32> to vector<16x1xf32>
    %56 = arith.mulf %50, %48 : vector<16x32xf32>
    %57 = arith.mulf %56, %49 : vector<16x32xf32>
    %58 = vector.broadcast %55 : vector<16x1xf32> to vector<16x32xf32>
    %59 = arith.mulf %57, %58 : vector<16x32xf32>
    %60 = tpu.iota {dimensions = array<i32: 0>} : vector<16x16xi32>
    %61 = vector.broadcast %2 : vector<1x16xi32> to vector<16x16xi32>
    %62 = arith.cmpi eq, %60, %61 : vector<16x16xi32>
    %63 = arith.extui %62 : vector<16x16xi1> to vector<16x16xi32>
    %64 = arith.sitofp %63 : vector<16x16xi32> to vector<16x16xf32>
    %cst_25 = arith.constant dense<0.000000e+00> : vector<16x32xf32>
    %65 = tpu.matmul %64, %59, %cst_25 {dimension_numbers = #tpu.dot_dimension_numbers<[1], [0], [0], [1], [0, 0, 1, 1], [], []>} : vector<16x16xf32>, vector<16x32xf32>, vector<16x32xf32> -> vector<16x32xf32>
    %66 = tpu.concatenate %65, %10 in 1 : vector<16x32xf32>, vector<16x5xf32> -> vector<16x37xf32>
    %c0_26 = arith.constant 0 : index
    %c0_27 = arith.constant 0 : index
    %67 = vector.load %arg10[%c0_26, %c0_27] : memref<37x3xf32, #tpu.memory_space<vmem>>, vector<37x3xf32>
    %cst_28 = arith.constant dense<0.000000e+00> : vector<16x3xf32>
    %68 = tpu.matmul %66, %67, %cst_28 {dimension_numbers = #tpu.dot_dimension_numbers<[1], [0], [0], [1], [0, 0, 1, 1], [], []>} : vector<16x37xf32>, vector<37x3xf32>, vector<16x3xf32> -> vector<16x3xf32>
    %c0_29 = arith.constant 0 : index
    %c0_30 = arith.constant 0 : index
    %69 = vector.load %arg11[%c0_29, %c0_30] : memref<16x3xf32, #tpu.memory_space<vmem>>, vector<16x3xf32>
    tpu.vector_store %arg11[%c0_29, %c0_30], %68 {strides = array<i32>} : memref<16x3xf32, #tpu.memory_space<vmem>>, vector<16x3xf32>,
    return
  }
  func.func @transform_0(%arg0: i32) -> (i32, i32) {
    %c0_i32 = arith.constant 0 : i32
    %c0_i32_0 = arith.constant 0 : i32
    %c0_i32_1 = arith.constant 0 : i32
    return %c0_i32, %c0_i32_0 : i32, i32
  }
  func.func @transform_1(%arg0: i32) -> (i32, i32) {
    %c0_i32 = arith.constant 0 : i32
    %c0_i32_0 = arith.constant 0 : i32
    %c0_i32_1 = arith.constant 0 : i32
    return %c0_i32, %c0_i32_0 : i32, i32
  }
  func.func @transform_2(%arg0: i32) -> (i32, i32) {
    %c0_i32 = arith.constant 0 : i32
    %c0_i32_0 = arith.constant 0 : i32
    %c0_i32_1 = arith.constant 0 : i32
    return %c0_i32, %c0_i32_0 : i32, i32
  }
  func.func @transform_3(%arg0: i32) -> (i32, i32) {
    %c0_i32 = arith.constant 0 : i32
    %c0_i32_0 = arith.constant 0 : i32
    %c0_i32_1 = arith.constant 0 : i32
    return %c0_i32, %c0_i32_0 : i32, i32
  }
  func.func @transform_4(%arg0: i32) -> (i32, i32) {
    %c0_i32 = arith.constant 0 : i32
    %c0_i32_0 = arith.constant 0 : i32
    %c0_i32_1 = arith.constant 0 : i32
    return %c0_i32, %c0_i32_0 : i32, i32
  }
  func.func @transform_5(%arg0: i32) -> (i32, i32) {
    %c0_i32 = arith.constant 0 : i32
    %c0_i32_0 = arith.constant 0 : i32
    %c0_i32_1 = arith.constant 0 : i32
    return %c0_i32, %c0_i32_0 : i32, i32
  }
  func.func @transform_6(%arg0: i32) -> (i32, i32) {
    %c0_i32 = arith.constant 0 : i32
    %c0_i32_0 = arith.constant 0 : i32
    %c0_i32_1 = arith.constant 0 : i32
    return %c0_i32, %c0_i32_0 : i32, i32
  }
  func.func @transform_7(%arg0: i32) -> (i32, i32) {
    %c0_i32 = arith.constant 0 : i32
    %c0_i32_0 = arith.constant 0 : i32
    %c0_i32_1 = arith.constant 0 : i32
    return %c0_i32, %c0_i32_0 : i32, i32
  }
  func.func @transform_8(%arg0: i32) -> (i32, i32) {
    %c0_i32 = arith.constant 0 : i32
    %c0_i32_0 = arith.constant 0 : i32
    %c0_i32_1 = arith.constant 0 : i32
    return %c0_i32, %c0_i32_0 : i32, i32
  }
  func.func @transform_9(%arg0: i32) -> (i32, i32) {
    %c0_i32 = arith.constant 0 : i32
    %c0_i32_0 = arith.constant 0 : i32
    %c0_i32_1 = arith.constant 0 : i32
    return %c0_i32, %c0_i32_0 : i32, i32
  }
  func.func @transform_10(%arg0: i32) -> (i32, i32) {
    %c0_i32 = arith.constant 0 : i32
    %c0_i32_0 = arith.constant 0 : i32
    %c0_i32_1 = arith.constant 0 : i32
    return %c0_i32, %c0_i32_0 : i32, i32
  }
}

</mosaic_0001>

<bundles_post_ra>
// kernel: model_forward.1
= control target key start
LH: loop header
LB: loop body
LE: loop exit
PB: predicated region body
PF: predicated region fallthrough
CT: control target
= control target key end

     0   :  { %v818_v0 = vmov 0   ;;  %vm68_vm0 = vcmask 1044480   ;;  %v46_v9 = vlaneseq  ;;  %vm61_vm1 = vcmask 39936   ;;  %s821_s14 = smov 8   ;;  %s823_s23 = smov 32   ;;  %s983_s3 = inlined_call_operand.vmem [shape: s32[16,1], index: 3, kind: input, shape index: {}]   ;;  %s984_s0 = inlined_call_operand.vmem [shape: s32[16,1], index: 0, kind: input, shape index: {}]   ;;  %s985_s1 = inlined_call_operand.vmem [shape: s32[16,1], index: 1, kind: input, shape index: {}]   ;;  %s986_s7 = inlined_call_operand.vmem [shape: f32[5,32], index: 7, kind: input, shape index: {}]   ;;  %s987_s4 = inlined_call_operand.vmem [shape: f32[16,3], index: 4, kind: input, shape index: {}]   ;;  %s988_s5 = inlined_call_operand.vmem [shape: f32[16,3], index: 5, kind: input, shape index: {}]   ;;  %s989_s8 = inlined_call_operand.vmem [shape: f32[12,64], index: 8, kind: input, shape index: {}]   ;;  %s990_s6 = inlined_call_operand.vmem [shape: f32[1,8], index: 6, kind: input, shape index: {}]   ;;  %s991_s2 = inlined_call_operand.vmem [shape: s32[1,16], index: 2, kind: input, shape index: {}]   ;;  %s992_s9 = inlined_call_operand.vmem [shape: f32[37,3], index: 9, kind: input, shape index: {}]   ;;  %s993_s10 = inlined_call_operand.vmem [shape: f32[16,3], index: 10, kind: output, shape index: {}]  }
   0x1   :  { %804 = vset.pattern.permute.xlu1 %v818_v0  ;;  %803 = vset.pattern.permute.xlu0 %v818_v0  ;;  %v40_v1 = vld [vmem:[%s983_s3] sm:$0xff]  ;;  %v41_v3 = vld [vmem:[%s983_s3 + $0x8] sm:$0xff]  ;;  %vm173_vm2 = vcmask 130048   ;;  %v819_v13 = vmov 0.0   ;;  %vm257_vm9 = vcmask 23552   ;;  %vm320_vm10 = vcmask 1043456  }
   0x2   :  { %v35_v2 = vld [vmem:[%s984_s0] sm:$0xff]  ;;  %49 = vperm.xlu0 %803, %v40_v1   ;;  %v43_v6 = vld [vmem:[%s987_s4 + $0x8] sm:$0xff]  ;;  %v47_v10 = vand.u32 127, %v46_v9  ;;  %vm280_vm11 = vcmask 7168   ;;  %vm308_vm12 = vcmask 64512   ;;  %vm313_vm13 = vcmask 97280  }
   0x3   :  { %148 = vperm.xlu1 %804, %v35_v2   ;;  %v37_v4 = vld [vmem:[%s985_s1] sm:$0xff]  ;;  %v36_v7 = vld [vmem:[%s984_s0 + $0x8] sm:$0xff] }
   0x4   :  { %v60_v5 = vld [vmem:[%s986_s7] sm:$0x1f]  ;;  %v38_v8 = vld [vmem:[%s985_s1 + $0x8] sm:$0xff] }
   0x5   :  { %751 = vmatprep.subr.msk.mxu0 %vm68_vm0, %v60_v5  ;;  %v42_v20 = vld [vmem:[%s987_s4] sm:$0xff]  ;;  %v45_v30 = vld [vmem:[%s988_s5 + $0x8] sm:$0xff] }
   0x6   :  { %752 = vmatpush3.msk.msra.mxu0 %vm68_vm0, %v60_v5  ;;  %52 = vperm.xlu0 %803, %v41_v3   ;;  %v44_v32 = vld [vmem:[%s988_s5] sm:$0xff]  ;;  %s820_s5 = smov 1   ;;  %v312_v48 = vld [vmem:[%s989_s8 + $0x8] sm:$0xf] }
   0x7   :  { %160 = vperm.xlu1 %804, %v37_v4   ;;  %756 = vmatprep.subr.mxu0 %v43_v6  ;;  %v311_v49 = vld [vmem:[%s989_s8] sm:$0xff] }
   0x8   :  { %v710_v56 = vld [vmem:[%s990_s6] ss:$0 sm:$0xff] }
   0xa   :  { %151 = vperm.xlu0 %803, %v36_v7   ;;  %v481_v7 = vshrl.u32 %v46_v9, 7  ;;  %v605_v9 = vld [vmem:[%s992_s9 + $0x10] sm:$0xff] }
   0xb   :  { %163 = vperm.xlu1 %804, %v38_v8   ;;  %v717_v8 = vld [vmem:[%s991_s2] ss:$0 sm:$0xff]  ;;  %s822_s2 = smov 96  }
   0xc   :  { %vm507_vm14 = vcmp.eq.s32.totalorder %v481_v7, %v717_v8 }
  0x7d   :  { %v50_v11 = vpop.permute.xlu0 %49 }
  0x7e   :  { %v149_v12 = vpop.permute.xlu1 %148  ;;  %vm54_vm3 = vcmp.eq.s32.totalorder %v47_v10, %v50_v11  ;;  %v607_v11 = vld [vmem:[%s992_s9 + $0x20] sm:$0x1f] }
  0x7f   :  { %vm153_vm4 = vcmp.eq.s32.totalorder %v47_v10, %v149_v12  ;;  %v907_v14 = vsel %vm54_vm3, 1.0, %v819_v13  ;;  %v606_v12 = vld [vmem:[%s992_s9 + $0x18] sm:$0xff]  ;;  %vm608_vm3 = vcmask 302080  }
  0x80   :  { %v704_v15 = vsel %vm153_vm4, 1.0, %v819_v13  ;;  %753 = vmatprep.mubr.msk.f32.mxu0 %vm61_vm1, %v907_v14 }
  0x81   :  { %774 = vmatprep.mubr.msk.f32.mxu1 %vm173_vm2, %v704_v15  ;;  %v53_v16 = vpop.permute.xlu0 %52 }
  0x82   :  { %v161_v17 = vpop.permute.xlu1 %160  ;;  %vm55_vm5 = vcmp.eq.s32.totalorder %v47_v10, %v53_v16 }
  0x83   :  { %vm165_vm6 = vcmp.eq.s32.totalorder %v47_v10, %v161_v17  ;;  %v914_v18 = vsel %vm55_vm5, 1.0, %v819_v13  ;;  %v482_v17 = vadd.s32 8, %v481_v7 }
  0x84   :  { %v706_v19 = vsel %vm165_vm6, 1.0, %v819_v13  ;;  %v805_v21 = vpack.i.bf16 %v914_v18, %v907_v14  ;;  %754 = vmatmul.mubr.msk.f32.vlgmr.msra.gmra.mxu0 %vm61_vm1, %v914_v18  ;;  %v604_v14 = vld [vmem:[%s992_s9 + $0x8] sm:$0xff]  ;;  %v603_v18 = vld [vmem:[%s992_s9] sm:$0xff]  ;;  %vm600_vm1 = vcmask 261120  }
  0x85   :  { %v171_v22 = vsub.f32 %v706_v19, %v704_v15  ;;  %v152_v23 = vpop.permute.xlu0 %151  ;;  %757 = vmatpush3.msra.mxu0 %v43_v6  ;;  %vm484_vm15 = vcmp.lt.s32.totalorder %v482_v17, 10 }
  0x86   :  { %v164_v24 = vpop.permute.xlu1 %163  ;;  %vm154_vm7 = vcmp.eq.s32.totalorder %v47_v10, %v152_v23  ;;  %758 = vmatprep.subr.mxu0 %v42_v20 }
  0x87   :  { %vm166_vm8 = vcmp.eq.s32.totalorder %v47_v10, %v164_v24  ;;  %760 = vmatprep.mubr.msk.f32.mxu0 %vm173_vm2, %v171_v22  ;;  %v705_v25 = vsel %vm154_vm7, 1.0, %v819_v13  ;;  %759 = vmatpush3.msra.mxu0 %v42_v20  ;;  %v718_v10 = vsel %vm507_vm14, 1.0, %v819_v13  ;;  %v716_v22 = vsel %vm484_vm15, 1.0, %v819_v13 }
  0x88   :  { %v707_v26 = vsel %vm166_vm8, 1.0, %v819_v13  ;;  %763 = vmatprep.subr.msk.mxu0 %vm320_vm10, %v312_v48 }
  0x89   :  { %v172_v27 = vsub.f32 %v707_v26, %v705_v25 }
  0x8b   :  { %761 = vmatmul.mubr.msk.f32.vlgmr.msra.gmra.mxu0 %vm173_vm2, %v172_v27 }
  0x8c   :  { %764 = vmatpush3.msk.msra.mxu0 %vm320_vm10, %v312_v48 }
  0x8d   :  { %765 = vmatprep.subr.mxu0 %v311_v49 }
  0x8e   :  { %766 = vmatpush3.msra.mxu0 %v311_v49 }
 0x144   :  { %v755_v28 = vpop.f32.mrf.mxu0 }
 0x145   :  { %770 = vmatprep.subr.mxu1 %v755_v28 }
 0x146   :  { %v138_v29 = vpop.f32.mrf.mxu0  ;;  %771 = vmatpush3.msra.mxu1 %v755_v28 }
 0x147   :  { %772 = vmatprep.subr.mxu1 %v138_v29 }
 0x148   :  { %773 = vmatpush3.msra.mxu1 %v138_v29 }
 0x149   :  { %775 = vmatmul.mubr.msk.f32.vlgmr.msra.gmra.mxu1 %vm173_vm2, %v705_v25  ;;  %784 = vmatprep.subr.msk.mxu1 %vm68_vm0, %v607_v11 }
 0x14a   :  { %785 = vmatpush3.msk.msra.mxu1 %vm68_vm0, %v607_v11  ;;  %vm508_vm0 = vcmp.eq.s32.totalorder %v482_v17, %v717_v8 }
 0x14b   :  { %v762_v31 = vpop.f32.mrf.mxu0  ;;  %786 = vmatprep.subr.mxu1 %v606_v12 }
 0x14c   :  { %v252_v33 = vadd.f32 %v762_v31, %v45_v30  ;;  %787 = vmatpush3.msra.mxu1 %v606_v12  ;;  %v719_v30 = vsel %vm508_vm0, 1.0, %v819_v13 }
 0x14d   :  { %v246_v34 = vpop.f32.mrf.mxu0  ;;  %788 = vmatprep.subr.mxu1 %v605_v9 }
 0x14e   :  { %v247_v35 = vadd.f32 %v246_v34, %v44_v32  ;;  %v256_v36 = vmul.f32 %v252_v33, %v252_v33  ;;  %789 = vmatpush3.msra.mxu1 %v605_v9 }
 0x14f   :  { %790 = vmatprep.subr.mxu1 %v604_v14 }
 0x150   :  { %v261_v37 = vsel %vm257_vm9, %v256_v36, 0.0  ;;  %v255_v38 = vmul.f32 %v247_v35, %v247_v35  ;;  %791 = vmatpush3.msra.mxu1 %v604_v14 }
 0x151   :  { %262 = vadd.xlane.f32.xlu1 %v261_v37  ;;  %792 = vmatprep.subr.mxu1 %v603_v18 }
 0x152   :  { %v258_v39 = vsel %vm257_vm9, %v255_v38, 0.0  ;;  %793 = vmatpush3.msra.mxu1 %v603_v18 }
 0x153   :  { %259 = vadd.xlane.f32.xlu0 %v258_v39 }
 0x1da   :  { %v263_v40 = vpop.xlane.xlu1 %262 }
 0x1db   :  { %v265_v41 = vmax.f32 %v263_v40, 1e-24 }
 0x1dc   :  { %v260_v42 = vpop.xlane.xlu0 %259 }
 0x1dd   :  { %810 = vrsqrt.f32 %v265_v41  ;;  %v264_v43 = vmax.f32 %v260_v42, 1e-24 }
 0x1df   :  { %812 = vrsqrt.f32 %v264_v43 }
 0x1ea   :  { %v811_v44 = vpop.eup %810 }
 0x1eb   :  { %v271_v45 = vmul.f32 %v811_v44, %v252_v33  ;;  %v269_v55 = vmul.f32 %v811_v44, %v263_v40 }
 0x1ec   :  { %v813_v46 = vpop.eup %812 }
 0x1ed   :  { %276 = vrot.lane.b32.xlu1 %v271_v45, %s820_s5  ;;  %v270_v47 = vmul.f32 %v813_v46, %v247_v35  ;;  %v268_v54 = vmul.f32 %v813_v46, %v260_v42  ;;  %v291_v58 = vsub.f32 %v269_v55, %v710_v56 }
 0x1ef   :  { %274 = vrot.lane.b32.xlu0 %v270_v47, %s820_s5  ;;  %v290_v57 = vsub.f32 %v268_v54, %v710_v56  ;;  %v293_v60 = vmul.f32 -1.6, %v291_v58 }
 0x1f1   :  { %v292_v59 = vmul.f32 -1.6, %v290_v57  ;;  %v295_v62 = vmul.f32 %v293_v60, %v291_v58 }
 0x1f3   :  { %v294_v61 = vmul.f32 %v292_v59, %v290_v57  ;;  %v298_v0 = vmul.f32 1.442695, %v295_v62 }
 0x1f5   :  { %v296_v63 = vmul.f32 1.442695, %v294_v61 }
 0x1f7   :  { %814 = vpow2.f32 %v296_v63 }
 0x1f8   :  { %816 = vpow2.f32 %v298_v0 }
 0x204   :  { %v815_v2 = vpop.eup %814 }
 0x205   :  { %v817_v4 = vpop.eup %816 }
 0x209   :  { %v776_v19 = vpop.f32.mrf.mxu1 }
 0x20b   :  { %v471_v25 = vpop.f32.mrf.mxu1 }
 0x25f   :  { %v277_v50 = vpop.permute.xlu1 %276 }
 0x260   :  { %v282_v51 = vsel %vm280_vm11, 1.0, %v277_v50 }
 0x261   :  { %304 = vrot.lane.b32.xlu1 %v282_v51, %s821_s14  ;;  %v275_v52 = vpop.permute.xlu0 %274 }
 0x262   :  { %v281_v53 = vsel %vm280_vm11, 1.0, %v275_v52 }
 0x263   :  { %302 = vrot.lane.b32.xlu0 %v281_v53, %s821_s14 }
 0x2d3   :  { %v305_v1 = vpop.permute.xlu1 %304 }
 0x2d4   :  { %v310_v6 = vsel %vm308_vm12, %v817_v4, %v305_v1 }
 0x2d5   :  { %v303_v3 = vpop.permute.xlu0 %302 }
 0x2d6   :  { %v309_v5 = vsel %vm308_vm12, %v815_v2, %v303_v3 }
 0x2d7   :  { %767 = vmatprep.mubr.msk.f32.mxu0 %vm313_vm13, %v309_v5 }
 0x2d8   :  { %768 = vmatmul.mubr.msk.f32.vlgmr.msra.gmra.mxu0 %vm313_vm13, %v310_v6 }
 0x2d9   :  { %781 = vmatprep.mubr.msk.f32.mxu0 %vm173_vm2, %v718_v10 }
 0x398   :  { %v769_v15 = vpop.f32.mrf.mxu0 }
 0x399   :  { %495 = vrot.lane.b32.xlu0 %v769_v15, %s822_s2  ;;  %v490_v20 = vmul.f32 %v776_v19, %v769_v15 }
 0x39a   :  { %v390_v16 = vpop.f32.mrf.mxu0 }
 0x39b   :  { %493 = vrot.lane.b32.xlu1 %v390_v16, %s822_s2  ;;  %v489_v27 = vmul.f32 %v471_v25, %v390_v16 }
 0x39d   :  { %806 = vrot.lane.b32.xlu0 %v805_v21, %s823_s23 }
 0x40b   :  { %v496_v23 = vpop.permute.xlu0 %495 }
 0x40c   :  { %v500_v24 = vmul.f32 %v496_v23, %v490_v20 }
 0x40d   :  { %v494_v26 = vpop.permute.xlu1 %493 }
 0x40e   :  { %v502_v28 = vmul.f32 %v716_v22, %v500_v24  ;;  %v499_v29 = vmul.f32 %v494_v26, %v489_v27 }
 0x40f   :  { %v807_v21 = vpop.permute.xlu0 %806 }
 0x410   :  { %777 = vmatprep.subr.mxu0 %v502_v28  ;;  %v808_v32 = vunpack.i.l.bf16 %v807_v21  ;;  %v809_v13 = vunpack.i.h.bf16 %v807_v21 }
 0x411   :  { %778 = vmatpush3.msra.mxu0 %v502_v28 }
 0x412   :  { %779 = vmatprep.subr.mxu0 %v499_v29 }
 0x413   :  { %780 = vmatpush3.msra.mxu0 %v499_v29 }
 0x414   :  { %782 = vmatmul.mubr.msk.f32.vlgmr.msra.gmra.mxu0 %vm173_vm2, %v719_v30 }
 0x4d4   :  { %v783_v31 = vpop.f32.mrf.mxu0 }
 0x4d5   :  { %v602_v35 = vsel %vm600_vm1, %v783_v31, %v809_v13 }
 0x4d6   :  { %v585_v33 = vpop.f32.mrf.mxu0 }
 0x4d7   :  { %v601_v34 = vsel %vm600_vm1, %v585_v33, %v808_v32 }
 0x4d8   :  { %794 = vmatprep.mubr.msk.f32.mxu1 %vm608_vm3, %v601_v34 }
 0x4d9   :  { %795 = vmatmul.mubr.msk.f32.vlgmr.msra.gmra.mxu1 %vm608_vm3, %v602_v35 }
 0x599   :  { %v796_v36 = vpop.f32.mrf.mxu1 }
 0x59a   :  { %694 = vst.msk [vmem:[%s993_s10 + $0x8] sm:$0xff] %vm257_vm9, %v796_v36 }
 0x59b   :  { %v684_v37 = vpop.f32.mrf.mxu1 }
 0x59c   :  { %693 = vst.msk [vmem:[%s993_s10] sm:$0xff] %vm257_vm9, %v684_v37 }

</bundles_post_ra>
